<compile_context>
chip_gen: v7x
topology: tpu7x:2x2x1
jax: 0.10.0
libtpu: 0.0.40
codegen_flags: <defaults>
</compile_context>

<pallas_src>
import jax
import jax.numpy as jnp
from jax.experimental import pallas as pl
from jax.experimental.pallas import tpu as pltpu

_LANE = 128          # lane-dense feature padding target
_NEG_SLOPE = 0.25


def _round_up(x, m):
    return ((x + m - 1) // m) * m


def _vmem_capacity_bytes():
    """Generation-aware VMEM size (v5e/v6e: 128 MiB, v7x: 64 MiB per core)."""
    try:
        return int(pltpu.get_tpu_info().vmem_capacity_bytes)
    except Exception:
        return 64 << 20   # conservative (v7x-sized) default


def _resident_vmem_estimate(n_pad, f_pad):
    """Worst-case VMEM bytes for the fully-resident fused kernel."""
    bf16, f32 = 2, 4
    # TODO(synk): pipeline_mode=pl.Buffered(1) on the constant-index inputs would
    # drop the 2x double-buffer factors and roughly double the resident threshold.
    est = (2 * n_pad * n_pad * bf16       # adj, resident input (double-buffered)
           + 2 * n_pad * f_pad * bf16     # x, resident input
           + 2 * f_pad * f_pad * bf16     # current layer's weight
           + 2 * f_pad * f32              # current layer's bias
           + 2 * n_pad * f_pad * f32      # full output block
           + n_pad * f_pad * bf16)        # h scratch
    return int(est * 1.3) + (8 << 20)     # compiler-temp headroom


# ---------------------------------------------------------------------------
# Path 1: fully VMEM-resident fused kernel (small / medium graphs).
# grid = (layer,).  adj is read from HBM exactly once, h never leaves VMEM,
# and only the last layer stores the output (single HBM writeback).
# ---------------------------------------------------------------------------
def _gcn_resident_kernel(x_ref, adj_ref, w_ref, b_ref, o_ref, h_ref):
    l = pl.program_id(0)

    @pl.when(l == 0)
    def _():
        h_ref[...] = x_ref[...]

    # support = h @ W[l]   (bf16 MXU inputs, f32 accumulation)
    support = jnp.dot(h_ref[...], w_ref[0],
                      preferred_element_type=jnp.float32).astype(jnp.bfloat16)
    # out = adj @ support + b[l].  Padded rows (>= n) end up as leaky_relu(bias),
    # which is harmless because adj's padded *columns* are zero; the final
    # result is sliced back to n rows in the wrapper.
    out = jnp.dot(adj_ref[...], support,
                  preferred_element_type=jnp.float32) + b_ref[0]
    out = jnp.where(out > 0, out, _NEG_SLOPE * out)

    h_ref[...] = out.astype(h_ref.dtype)

    @pl.when(l == pl.num_programs(0) - 1)
    def _():
        o_ref[...] = out   # only write; constant out index_map -> one writeback


def _forward_resident(x, adj_p, w_stack, b_stack, cfg):
    n_pad, f_pad = cfg["n_pad"], cfg["f_pad"]
    n, in_dim = x.shape
    x_p = jnp.zeros((n_pad, f_pad), jnp.bfloat16).at[:n, :in_dim].set(
        x.astype(jnp.bfloat16))
    return pl.pallas_call(
        _gcn_resident_kernel,
        out_shape=jax.ShapeDtypeStruct((n_pad, f_pad), jnp.float32),
        grid_spec=pltpu.PrefetchScalarGridSpec(
            num_scalar_prefetch=0,
            grid=(3,),
            in_specs=[
                pl.BlockSpec((n_pad, f_pad), lambda l: (0, 0)),        # x (resident)
                pl.BlockSpec((n_pad, n_pad), lambda l: (0, 0)),        # adj (resident)
                pl.BlockSpec((1, f_pad, f_pad), lambda l: (l, 0, 0)),  # W[l] only
                pl.BlockSpec((1, 1, f_pad), lambda l: (l, 0, 0)),      # b[l] only
            ],
            out_specs=pl.BlockSpec((n_pad, f_pad), lambda l: (0, 0)),
            scratch_shapes=[pltpu.VMEM((n_pad, f_pad), jnp.bfloat16)],  # h
        ),
        compiler_params=pltpu.CompilerParams(
            dimension_semantics=("arbitrary",),      # layers are sequential
            vmem_limit_bytes=cfg["vmem_limit"],
        ),
    )(x_p, adj_p, w_stack, b_stack)


# ---------------------------------------------------------------------------
# Path 2: tiled per-layer kernel (graphs whose adjacency does not fit VMEM).
# support = h @ W is computed in XLA (it is only n x 128 bf16); the kernel
# streams large adj tiles; the row axis is "parallel" (v7x uses both cores).
# ---------------------------------------------------------------------------
def _gcn_layer_kernel(sup_ref, adj_ref, b_ref, o_ref, acc_ref):
    k = pl.program_id(1)

    @pl.when(k == 0)
    def _():
        acc_ref[...] = jnp.zeros_like(acc_ref)

    acc_ref[...] += jnp.dot(adj_ref[...], sup_ref[...],
                            preferred_element_type=jnp.float32)

    @pl.when(k == pl.num_programs(1) - 1)
    def _():
        out = acc_ref[...] + b_ref[...]
        o_ref[...] = jnp.where(out > 0, out, _NEG_SLOPE * out).astype(o_ref.dtype)


def _layer_call(adj_p, support_p, bias, tm, tk, out_dtype):
    n_rows, n_cols = adj_p.shape
    f_pad = support_p.shape[1]
    grid = (n_rows // tm, n_cols // tk)
    return pl.pallas_call(
        _gcn_layer_kernel,
        out_shape=jax.ShapeDtypeStruct((n_rows, f_pad), out_dtype),
        grid_spec=pltpu.PrefetchScalarGridSpec(
            num_scalar_prefetch=0,
            grid=grid,
            in_specs=[
                pl.BlockSpec((tk, f_pad), lambda i, k: (k, 0)),   # support strip
                pl.BlockSpec((tm, tk), lambda i, k: (i, k)),      # big adj tile
                pl.BlockSpec((1, f_pad), lambda i, k: (0, 0)),    # bias
            ],
            out_specs=pl.BlockSpec((tm, f_pad), lambda i, k: (i, 0)),
            scratch_shapes=[pltpu.VMEM((tm, f_pad), jnp.float32)],
        ),
        compiler_params=pltpu.CompilerParams(
            dimension_semantics=("parallel", "arbitrary"),
        ),
    )(support_p, adj_p, bias)


def _forward_tiled(x, adj_p, w_stack, b_stack, cfg):
    n_cols = cfg["n_cols"]
    f_pad, tm, tk, n = cfg["f_pad"], cfg["tm"], cfg["tk"], cfg["n"]
    in_dim = x.shape[1]
    h = jnp.zeros((n_cols, f_pad), jnp.bfloat16).at[:n, :in_dim].set(
        x.astype(jnp.bfloat16))
    out = None
    for l in range(3):
        support = jnp.dot(h, w_stack[l],
                          preferred_element_type=jnp.float32).astype(jnp.bfloat16)
        last = (l == 2)
        out = _layer_call(adj_p, support, b_stack[l], tm, tk,
                          jnp.float32 if last else jnp.bfloat16)
        if not last:
            # h for the next layer; padded rows are kept exactly zero.
            h = jnp.zeros((n_cols, f_pad), jnp.bfloat16).at[:n].set(out[:n])
    return out


# ---------------------------------------------------------------------------
# Public API: prepare-once (adj pad/cast, weight stacking, plan choice) + apply.
# ---------------------------------------------------------------------------
def gcn_e_prepare(adj, params, force_tiled=False):
    """One-time preprocessing: pad + cast adj to bf16, stack W/b, pick the plan."""
    assert len(params) == 3
    n = adj.shape[0]
    dims = [params[0][0].shape[0]] + [w.shape[1] for w, _ in params]
    f_pad = _round_up(max(dims), _LANE)

    w_stack = jnp.zeros((3, f_pad, f_pad), jnp.bfloat16)
    b_stack = jnp.zeros((3, 1, f_pad), jnp.float32)
    for li, (w, b) in enumerate(params):
        d_in, d_out = w.shape
        w_stack = w_stack.at[li, :d_in, :d_out].set(w.astype(jnp.bfloat16))
        b_stack = b_stack.at[li, 0, :d_out].set(b.astype(jnp.float32))

    budget = _vmem_capacity_bytes() - (16 << 20)

    n_pad = _round_up(n, _LANE)
    est = _resident_vmem_estimate(n_pad, f_pad)
    if (not force_tiled) and est <= budget:
        adj_p = jnp.zeros((n_pad, n_pad), jnp.bfloat16).at[:n, :n].set(
            adj.astype(jnp.bfloat16))
        cfg = dict(path="resident", n=n, n_pad=n_pad, f_pad=f_pad,
                   out_dim=dims[-1],
                   vmem_limit=int(min(max(est, 32 << 20), budget)))
        return cfg, dict(adj=adj_p, w=w_stack, b=b_stack)

    # Tiled fallback: pad rows to tm and cols to tk independently (no lcm blow-up).
    tm = min(512, _round_up(n, 256))
    tk = min(1024, _round_up(n, 256))
    n_rows = _round_up(n, tm)
    n_cols = _round_up(n, tk)
    adj_p = jnp.zeros((n_rows, n_cols), jnp.bfloat16).at[:n, :n].set(
        adj.astype(jnp.bfloat16))
    cfg = dict(path="tiled", n=n, n_rows=n_rows, n_cols=n_cols, f_pad=f_pad,
               out_dim=dims[-1], tm=tm, tk=tk)
    return cfg, dict(adj=adj_p, w=w_stack, b=b_stack)


def gcn_e_apply(prepared, x):
    cfg, bufs = prepared
    if cfg["path"] == "resident":
        out = _forward_resident(x, bufs["adj"], bufs["w"], bufs["b"], cfg)
    else:
        out = _forward_tiled(x, bufs["adj"], bufs["w"], bufs["b"], cfg)
    return out[:cfg["n"], :cfg["out_dim"]]


def gcn_e_forward(x, adj, params):
    """One-shot convenience wrapper (prefer prepare-once + apply for repeated calls)."""
    return gcn_e_apply(gcn_e_prepare(adj, params), x)


# ---------------------------------------------------------------------------
# Parameter init + references
# ---------------------------------------------------------------------------
def init_gcn_e_params(key, in_dim, hgcn_dim):
    """Deterministic kaiming-style weights + zero biases (matches module init intent)."""
    dims = [in_dim] + list(hgcn_dim)
    params = []
    for i in range(3):
        key, sub = jax.random.split(key)
        std = (2.0 / dims[i]) ** 0.5
        w = std * jax.random.normal(sub, (dims[i], dims[i + 1]), dtype=jnp.float32)
        b = jnp.zeros((dims[i + 1],), dtype=jnp.float32)
        params.append((w, b))
    return params


def _reference_fp32(x, adj, params):
    """Pure fp32 reference: numerics of the original PyTorch GCN_E."""
    h = x
    for w, b in params:
        h = adj @ (h @ w) + b
        h = jnp.where(h > 0, h, _NEG_SLOPE * h)
    return h


def _reference_bf16(x, adj, params):
    """Reference with the kernel's exact bf16-in / f32-accumulate numerics."""
    adj_b = adj.astype(jnp.bfloat16)
    h = x.astype(jnp.bfloat16)
    out = None
    for w, b in params:
        s = jnp.dot(h, w.astype(jnp.bfloat16),
                    preferred_element_type=jnp.float32).astype(jnp.bfloat16)
        out = jnp.dot(adj_b, s, preferred_element_type=jnp.float32) + b
        out = jnp.where(out > 0, out, _NEG_SLOPE * out)
        h = out.astype(jnp.bfloat16)
    return out


if __name__ == "__main__":
    key = jax.random.PRNGKey(0)
    n_nodes = 200            # deliberately not tile-aligned: exercises padding path
    in_dim = 16
    hgcn_dim = [32, 32, 16]

    k_x, k_adj, k_p = jax.random.split(key, 3)
    x = jax.random.normal(k_x, (n_nodes, in_dim), dtype=jnp.float32)

    # dense symmetric row-normalized adjacency (torch.sparse.mm input, densified)
    a = (jax.random.uniform(k_adj, (n_nodes, n_nodes)) < 0.05).astype(jnp.float32)
    a = jnp.maximum(a, a.T) + jnp.eye(n_nodes, dtype=jnp.float32)
    adj = a / jnp.sum(a, axis=1, keepdims=True)

    params = init_gcn_e_params(k_p, in_dim, hgcn_dim)

    ref_bf16 = _reference_bf16(x, adj, params)
    ref_fp32 = _reference_fp32(x, adj, params)

    # prepare once (adj pad + bf16 cast hoisted out of the per-call path), then apply
    prepared = gcn_e_prepare(adj, params)
    out = jax.block_until_ready(gcn_e_apply(prepared, x))
    assert out.shape == (n_nodes, hgcn_dim[-1])
    assert jnp.allclose(out, ref_bf16, atol=5e-3, rtol=5e-3), float(
        jnp.max(jnp.abs(out - ref_bf16)))
    assert jnp.allclose(out, ref_fp32, atol=5e-2, rtol=5e-2), float(
        jnp.max(jnp.abs(out - ref_fp32)))

    # also exercise the tiled fallback path (used when adj doesn't fit VMEM)
    prepared_t = gcn_e_prepare(adj, params, force_tiled=True)
    out_t = jax.block_until_ready(gcn_e_apply(prepared_t, x))
    assert out_t.shape == (n_nodes, hgcn_dim[-1])
    assert jnp.allclose(out_t, ref_bf16, atol=5e-3, rtol=5e-3), float(
        jnp.max(jnp.abs(out_t - ref_bf16)))
    assert jnp.allclose(out_t, ref_fp32, atol=5e-2, rtol=5e-2), float(
        jnp.max(jnp.abs(out_t - ref_fp32)))

    print("KERNEL_OK")
</pallas_src>

<mosaic_0001>
module attributes {stable_mosaic.version = 11 : i64} {
  func.func @_gcn_resident_kernel(%arg0: i32, %arg1: memref<256x128xbf16, #tpu.memory_space<vmem>>, %arg2: memref<256x256xbf16, #tpu.memory_space<vmem>>, %arg3: memref<1x128x128xbf16, #tpu.memory_space<vmem>>, %arg4: memref<1x1x128xf32, #tpu.memory_space<vmem>>, %arg5: memref<256x128xf32, #tpu.memory_space<vmem>>, %arg6: memref<256x128xbf16, #tpu.memory_space<vmem>>) attributes {dimension_semantics = [#tpu.dimension_semantics<arbitrary>], iteration_bounds = array<i64: 3>, scalar_prefetch = 0 : i64, scratch_operands = 1 : i64, tpu.core_type = #tpu.core_type<tc>, window_params = [{pipeline_mode = #tpu.pipeline_mode<synchronous>, transform_indices = @transform_0, window_bounds = array<i64: 256, 128>}, {pipeline_mode = #tpu.pipeline_mode<synchronous>, transform_indices = @transform_1, window_bounds = array<i64: 256, 256>}, {transform_indices = @transform_2, window_bounds = array<i64: 1, 128, 128>}, {transform_indices = @transform_3, window_bounds = array<i64: 1, 1, 128>}, {pipeline_mode = #tpu.pipeline_mode<synchronous>, transform_indices = @transform_4, window_bounds = array<i64: 256, 128>}]} {
    %c0_i32 = arith.constant 0 : i32
    %0 = arith.cmpi eq, %arg0, %c0_i32 : i32
    %1 = arith.extui %0 : i1 to i32
    %c0_i32_0 = arith.constant 0 : i32
    %2 = arith.cmpi ne, %1, %c0_i32_0 : i32
    scf.if %2 {
      %c0_16 = arith.constant 0 : index
      %c0_17 = arith.constant 0 : index
      %24 = vector.load %arg1[%c0_16, %c0_17] : memref<256x128xbf16, #tpu.memory_space<vmem>>, vector<256x128xbf16>
      %c0_18 = arith.constant 0 : index
      %c0_19 = arith.constant 0 : index
      %25 = vector.load %arg6[%c0_18, %c0_19] : memref<256x128xbf16, #tpu.memory_space<vmem>>, vector<256x128xbf16>
      tpu.vector_store %arg6[%c0_18, %c0_19], %24 {strides = array<i32>} : memref<256x128xbf16, #tpu.memory_space<vmem>>, vector<256x128xbf16>,
    } else {
    }
    %c0 = arith.constant 0 : index
    %c0_1 = arith.constant 0 : index
    %3 = vector.load %arg6[%c0, %c0_1] : memref<256x128xbf16, #tpu.memory_space<vmem>>, vector<256x128xbf16>
    %c0_2 = arith.constant 0 : index
    %c0_3 = arith.constant 0 : index
    %c0_4 = arith.constant 0 : index
    %4 = vector.load %arg3[%c0_2, %c0_3, %c0_4] : memref<1x128x128xbf16, #tpu.memory_space<vmem>>, vector<1x128x128xbf16>
    %5 = vector.shape_cast %4 : vector<1x128x128xbf16> to vector<128x128xbf16>
    %cst = arith.constant dense<0.000000e+00> : vector<256x128xf32>
    %6 = tpu.matmul %3, %5, %cst {dimension_numbers = #tpu.dot_dimension_numbers<[1], [0], [0], [1], [0, 0, 1, 1], [], []>} : vector<256x128xbf16>, vector<128x128xbf16>, vector<256x128xf32> -> vector<256x128xf32>
    %7 = arith.truncf %6 : vector<256x128xf32> to vector<256x128xbf16>
    %c0_5 = arith.constant 0 : index
    %c0_6 = arith.constant 0 : index
    %8 = vector.load %arg2[%c0_5, %c0_6] : memref<256x256xbf16, #tpu.memory_space<vmem>>, vector<256x256xbf16>
    %cst_7 = arith.constant dense<0.000000e+00> : vector<256x128xf32>
    %9 = tpu.matmul %8, %7, %cst_7 {dimension_numbers = #tpu.dot_dimension_numbers<[1], [0], [0], [1], [0, 0, 1, 1], [], []>} : vector<256x256xbf16>, vector<256x128xbf16>, vector<256x128xf32> -> vector<256x128xf32>
    %c0_8 = arith.constant 0 : index
    %c0_9 = arith.constant 0 : index
    %c0_10 = arith.constant 0 : index
    %10 = vector.load %arg4[%c0_8, %c0_9, %c0_10] : memref<1x1x128xf32, #tpu.memory_space<vmem>>, vector<1x1x128xf32>
    %11 = vector.shape_cast %10 : vector<1x1x128xf32> to vector<1x128xf32>
    %12 = vector.broadcast %11 : vector<1x128xf32> to vector<256x128xf32>
    %13 = arith.addf %9, %12 : vector<256x128xf32>
    %cst_11 = arith.constant 0.000000e+00 : f32
    %14 = vector.broadcast %cst_11 : f32 to vector<256x128xf32>
    %15 = arith.cmpf ogt, %13, %14 : vector<256x128xf32>
    %cst_12 = arith.constant 2.500000e-01 : f32
    %16 = vector.broadcast %cst_12 : f32 to vector<256x128xf32>
    %17 = arith.mulf %16, %13 : vector<256x128xf32>
    %18 = arith.select %15, %13, %17 : vector<256x128xi1>, vector<256x128xf32>
    %19 = arith.truncf %18 : vector<256x128xf32> to vector<256x128xbf16>
    %c0_13 = arith.constant 0 : index
    %c0_14 = arith.constant 0 : index
    %20 = vector.load %arg6[%c0_13, %c0_14] : memref<256x128xbf16, #tpu.memory_space<vmem>>, vector<256x128xbf16>
    tpu.vector_store %arg6[%c0_13, %c0_14], %19 {strides = array<i32>} : memref<256x128xbf16, #tpu.memory_space<vmem>>, vector<256x128xbf16>,
    %c2_i32 = arith.constant 2 : i32
    %21 = arith.cmpi eq, %arg0, %c2_i32 : i32
    %22 = arith.extui %21 : i1 to i32
    %c0_i32_15 = arith.constant 0 : i32
    %23 = arith.cmpi ne, %22, %c0_i32_15 : i32
    scf.if %23 {
      %c0_16 = arith.constant 0 : index
      %c0_17 = arith.constant 0 : index
      %24 = vector.load %arg5[%c0_16, %c0_17] : memref<256x128xf32, #tpu.memory_space<vmem>>, vector<256x128xf32>
      tpu.vector_store %arg5[%c0_16, %c0_17], %18 {strides = array<i32>} : memref<256x128xf32, #tpu.memory_space<vmem>>, vector<256x128xf32>,
    } else {
    }
    return
  }
  func.func @transform_0(%arg0: i32) -> (i32, i32) {
    %c0_i32 = arith.constant 0 : i32
    %c0_i32_0 = arith.constant 0 : i32
    %c0_i32_1 = arith.constant 0 : i32
    return %c0_i32, %c0_i32_0 : i32, i32
  }
  func.func @transform_1(%arg0: i32) -> (i32, i32) {
    %c0_i32 = arith.constant 0 : i32
    %c0_i32_0 = arith.constant 0 : i32
    %c0_i32_1 = arith.constant 0 : i32
    return %c0_i32, %c0_i32_0 : i32, i32
  }
  func.func @transform_2(%arg0: i32) -> (i32, i32, i32) {
    %c0_i32 = arith.constant 0 : i32
    %c0_i32_0 = arith.constant 0 : i32
    %c0_i32_1 = arith.constant 0 : i32
    return %arg0, %c0_i32, %c0_i32_0 : i32, i32, i32
  }
  func.func @transform_3(%arg0: i32) -> (i32, i32, i32) {
    %c0_i32 = arith.constant 0 : i32
    %c0_i32_0 = arith.constant 0 : i32
    %c0_i32_1 = arith.constant 0 : i32
    return %arg0, %c0_i32, %c0_i32_0 : i32, i32, i32
  }
  func.func @transform_4(%arg0: i32) -> (i32, i32) {
    %c0_i32 = arith.constant 0 : i32
    %c0_i32_0 = arith.constant 0 : i32
    %c0_i32_1 = arith.constant 0 : i32
    return %c0_i32, %c0_i32_0 : i32, i32
  }
}

</mosaic_0001>

<bundles_post_ra>
// kernel: tpu_custom_call.1
= control target key start
LH: loop header
LB: loop body
LE: loop exit
PB: predicated region body
PF: predicated region fallthrough
CT: control target
= control target key end

     0   :  { %9 = vsyncpa [#allocation4], 0  ;;  %s2247_s0 = inlined_call_operand.hbm [shape: bf16[256,128], index: 0, kind: input, shape index: {}]   ;;  %s2248_s1 = inlined_call_operand.hbm [shape: bf16[256,256], index: 1, kind: input, shape index: {}]   ;;  %s2249_s2 = inlined_call_operand.hbm [shape: bf16[3,128,128], index: 2, kind: input, shape index: {}]   ;;  %s2250_s3 = inlined_call_operand.vmem [shape: f32[3,1,128], index: 3, kind: input, shape index: {}]   ;;  %s2251_s4 = inlined_call_operand.hbm [shape: f32[256,128], index: 4, kind: output, shape index: {}]  }
   0x1   :  { %10 = vsyncpa [#allocation7], 0 }
   0x2   :  { %11 = vsyncpa [#allocation5], 0  ;;  %s1878_s15 = smov 0   ;;  %s1880_s16 = smov 0  }
   0x3   :  { %s1882_s17 = smov 0   ;;  %s1884_s18 = smov 0  }
   0x4 LB: > { %s1897_s19 = sadd.s32 4294967295, %s1841_s18   ;;  %s1900_s20 = sadd.s32 1, %s1841_s18   ;;  %s1841_s18 = sphi %s1884_s18, %s2272_s18   ;;  %s1837_s17 = sphi %s1882_s17, %s2271_s17   ;;  %s1833_s16 = sphi %s1880_s16, %s2270_s16   ;;  %s1829_s15 = sphi %s1878_s15, %s2269_s15  }
   0x5   : > { %s63_s21 = ssub.s32 %s1841_s18, %s1900_s20  ;;  %s66_s22 = sadd.s32 1, %s1837_s17 }
   0x6   : > { %p64_p0 = scmp.eq.s32.totalorder %s63_s21, 0  ;;  %p73_p1 = scmp.ne.s32.totalorder %s1837_s17, %s1833_s16 }
   0x7   : > { %p74_p2 = scmp.eq.s32.totalorder %s1841_s18, 0  ;;  %p79_p3 = scmp.ne.s32.totalorder %s1833_s16, %s1829_s15 }
   0x8   : > { %s1910_s23 = scalar_select %p64_p0, %s1837_s17, %s66_s22  }
   0x9   : > { %p1912_p4 = por %p74_p2, %p73_p1  ;;  %p2252_p5 = scmp.eq.s32.totalorder %s1897_s19, 0 }
   0xa   : > { %p1263_p6 = scmp.ge.s32.totalorder %s1841_s18, 1  ;;  %p137_p7 = scmp.lt.s32.totalorder %s1841_s18, 4 }
   0xb   : > { %p1921_p8 = por %p2252_p5, %p79_p3  ;;  %s1843_s27 = smov [#allocation3]  }
   0xc   : > { %p1926_p10 = pnand %p1263_p6, %p137_p7  ;;  %s149_s28 = sshll.u32 %s1843_s27, 4  ;;  %s150_s28 = int_to_ptr.vmem [resolvable:$true] %s149_s28 }
   0xd   : > { %s2257_s25 = scalar_select %p1921_p8, 1, 0 }
   0xe   : > { %s2258_s26 = scalar_select %p1926_p10, 1, 0 }
   0xf   : > { %p1552_p11 = pneg %p1926_p10  ;;  %p1565_p13 = scmp.lt.s32.totalorder %s1841_s18, 3 }
  0x10   : > { %s1683_s7 = scalar_lea.hbm %s2247_s0, 2048 }
  0x11   : > { %p1934_p12 = pnand %p1552_p11, %p2252_p5  ;;  %p1941_p0 = pnand %p1565_p13, %p1912_p4 }
  0x12   : > { %p1684_p1 = scmp.ne.s32.totalorder %s2247_s0, %s1683_s7  ;;  %p1690_p4 = scmp.lt.u32.totalorder %s1683_s7, %s2247_s0 }
  0x13   : > { %s2260_s30 = scalar_select %p1941_p0, 1, 0 }
  0x14   : > { %p1685_p2 = pneg %p1934_p12 }
  0x16   : > { %p1686_p3 = pnand %p1685_p2, %p1684_p1 }
  0x18   : > { %p1687_p6 = pneg %p1686_p3 }
  0x1a   : > { %p1692_p7 = pnand %p1690_p4, %p1687_p6 }
  0x1c   : > { %1695 = shalt.err (!%p1692_p7)
}
  0x1d   : > { %s1696_s12 = scalar_lea.vmem %s150_s28, 2048  ;;  %p1704_p5 = scmp.lt.s32.totalorder %s150_s28, %s150_s28 }
  0x1e   : > { %p1697_p11 = scmp.ne.s32.totalorder %s150_s28, %s1696_s12  ;;  %p1705_p8 = scmp.lt.s32.totalorder %s1696_s12, %s1696_s12 }
  0x20   : > { %p1699_p13 = pnand %p1697_p11, %p1685_p2  ;;  %p1706_p10 = por %p1705_p8, %p1704_p5 }
  0x22   : > { %p1700_p9 = pneg %p1699_p13 }
  0x24   : > { %p1707_p0 = pnand %p1706_p10, %p1700_p9 }
  0x26   : > { %1710 = shalt.err (!%p1707_p0)
}
  0x27   : > { %s1844_s13 = smov 64   ;;  %s1845_s14 = smov 4  }
  0x28   : > { %1555 = dma.hbm_to_vmem [thread:$0]  (!%p1934_p12), %s2247_s0, 2048, %s150_s28, [#allocation4], %s1844_s13, %s1844_s13, %s1845_s14  }
  0x29   : > { %s1846_s22 = smov [#allocation6]   ;;  %s1711_s6 = scalar_lea.hbm %s2248_s1, 4096 }
  0x2a   : > { %s162_s24 = sshll.u32 %s1846_s22, 4  ;;  %p1712_p5 = scmp.ne.s32.totalorder %s2248_s1, %s1711_s6  ;;  %s163_s24 = int_to_ptr.vmem [resolvable:$true] %s162_s24 }
  0x2b   : > { %p1718_p10 = scmp.lt.u32.totalorder %s1711_s6, %s2248_s1 }
  0x2c   : > { %p1714_p8 = pnand %p1712_p5, %p1685_p2 }
  0x2e   : > { %p1715_p9 = pneg %p1714_p8 }
  0x30   : > { %p1720_p0 = pnand %p1718_p10, %p1715_p9 }
  0x32   : > { %1723 = shalt.err (!%p1720_p0)
}
  0x33   : > { %s1724_s28 = scalar_lea.vmem %s163_s24, 4096  ;;  %p1732_p4 = scmp.lt.s32.totalorder %s163_s24, %s163_s24 }
  0x34   : > { %p1725_p1 = scmp.ne.s32.totalorder %s163_s24, %s1724_s28  ;;  %p1733_p7 = scmp.lt.s32.totalorder %s1724_s28, %s1724_s28 }
  0x36   : > { %p1727_p3 = pnand %p1725_p1, %p1685_p2  ;;  %p1734_p11 = por %p1733_p7, %p1732_p4 }
  0x38   : > { %p1728_p6 = pneg %p1727_p3 }
  0x3a   : > { %p1735_p13 = pnand %p1734_p11, %p1728_p6 }
  0x3c   : > { %1738 = shalt.err (!%p1735_p13)
}
  0x3d   : > { %s1847_s11 = smov 128   ;;  %s1848_s12 = smov 8  }
  0x3e   : > { %1558 = dma.hbm_to_vmem [thread:$0]  (!%p1934_p12), %s2248_s1, 4096, %s163_s24, [#allocation7], %s1847_s11, %s1847_s11, %s1848_s12  }
  0x3f   : > { %s176_s22 = sand.u32 1, %s1841_s18   ;;  %s178_s27 = sand.u32 1, %s1837_s17  }
  0x40   : > { %s1267_s5 = sshll.u32 %s178_s27, 6  ;;  %s1337_s6 = sshll.u32 %s1841_s18, 10 }
  0x41   : > { %s1996_s9 = scalar_lea.hbm %s2249_s2, %s1337_s6  ;;  %s180_s10 = scalar_lea.vmem [#allocation8], %s1267_s5 }
  0x42   : > { %s187_s28 = sshll.u32 %s180_s10, 4  ;;  %s2000_s29 = scalar_lea.sflag [#allocation4], %s176_s22  ;;  %s1998_s28 = int_to_ptr.vmem [resolvable:$true] %s187_s28 }
  0x43   : > { %s1739_s24 = scalar_lea.hbm %s1996_s9, 1024  ;;  %p2261_p2 = scmp.ne.s32.totalorder %s2260_s30, 0 }
  0x44   : > { %p1740_p12 = scmp.ne.s32.totalorder %s1996_s9, %s1739_s24  ;;  %s1744_s12 = scalar_lea.hbm %s2249_s2, 3072 }
  0x45   : > { %p1741_p5 = pneg %p2261_p2  ;;  %p1745_p10 = scmp.lt.u32.totalorder %s1996_s9, %s2249_s2 }
  0x46   : > { %p1746_p0 = scmp.lt.u32.totalorder %s1744_s12, %s1739_s24  ;;  %p1748_p3 = scmp.lt.u32.totalorder %s1739_s24, %s1996_s9 }
  0x47   : > { %p1742_p8 = pnand %p1741_p5, %p1740_p12 }
  0x48   : > { %p1747_p1 = por %p1746_p0, %p1745_p10 }
  0x49   : > { %p1743_p9 = pneg %p1742_p8 }
  0x4a   : > { %p1749_p6 = por %p1748_p3, %p1747_p1 }
  0x4c   : > { %p1750_p4 = pnand %p1749_p6, %p1743_p9 }
  0x4e   : > { %1753 = shalt.err (!%p1750_p4)
}
  0x4f   : > { %s1754_s22 = scalar_lea.vmem %s1998_s28, 1024  ;;  %s1849_s27 = smov [#allocation8]  }
  0x50   : > { %p1755_p7 = scmp.ne.s32.totalorder %s1998_s28, %s1754_s22  ;;  %s1759_s5 = sshll.u32 %s1849_s27, 4  ;;  %s1760_s5 = int_to_ptr.vmem [resolvable:$false] %s1759_s5 }
  0x51   : > { %s1761_s6 = scalar_lea.vmem %s1760_s5, 2048  ;;  %p1762_p12 = scmp.lt.s32.totalorder %s1998_s28, %s1760_s5 }
  0x52   : > { %p1757_p11 = pnand %p1755_p7, %p1741_p5  ;;  %p1763_p8 = scmp.lt.s32.totalorder %s1761_s6, %s1754_s22 }
  0x54   : > { %p1758_p13 = pneg %p1757_p11  ;;  %p1764_p10 = por %p1763_p8, %p1762_p12 }
  0x56   : > { %p1765_p0 = pnand %p1764_p10, %p1758_p13 }
  0x58   : > { %1768 = shalt.err (!%p1765_p0)
}
  0x59   : > { %1562 = dma.hbm_to_vmem [thread:$0]  (!%p2261_p2), %s1996_s9, 1024, %s1998_s28, %s2000_s29, %s1844_s13, %s1844_s13, %s1845_s14  }
  0x5a   : > { %p2262_p5 = scmp.ne.s32.totalorder %s2258_s26, 0 }
  0x5b   : > { %p2263_p9 = scmp.eq.s32.totalorder (!%p2262_p5), %s1897_s19, 0 }
  0x5c   : > { %205 = sbr.rel (%p2262_p5) target bundleno = 773 (0x305), region = 36 }
  0x63   : > { %1812 = dma.done.wait (%p2263_p9), [#allocation4], 2048   ;;  %p2264_p1 = pmov %p2263_p9 }
  0x65   : > { %1814 = vsyncadd (%p2264_p1), [#allocation4], 4294965248  ;;  %p2265_p3 = pmov %p2264_p1 }
  0x66   : > { %p2266_p6 = pmov %p2264_p1 }
  0x67   : > { %1816 = dma.done.wait (%p2265_p3), [#allocation7], 4096  }
  0x68   : > { %1818 = vsyncadd (%p2266_p6), [#allocation7], 4294963200  ;;  %s215_s30 = sand.u32 1, %s1897_s19   ;;  %s217_s13 = sand.u32 1, %s1833_s16  }
  0x69   : > { %s1273_s14 = sshll.u32 %s217_s13, 6  ;;  %s216_s26 = scalar_lea.sflag [#allocation4], %s215_s30 }
  0x6a   : > { %s2043_s7 = scalar_lea.vmem [#allocation8], %s1273_s14  ;;  %p2267_p2 = scmp.ne.s32.totalorder %s2257_s25, 0 }
  0x6c   : > { %1820 = dma.done.wait (%p2267_p2), %s216_s26, 1024  }
  0x6d   : > { %1822 = vsyncadd (%p2267_p2), %s216_s26, 4294966272  ;;  %p242_p4 = scmp.lt.s32.totalorder %s1897_s19, 2  ;;  %p2268_p7 = scmp.ne.s32.totalorder %s1897_s19, 0 }
  0x6e   : > { %v1611_v0 = vld [vmem:[#allocation3] sm:$0xff] (!%p2268_p7)   ;;  %v1612_v1 = vld [vmem:[#allocation3 + $0x8] sm:$0xff] (!%p2268_p7)   ;;  %v1613_v2 = vld [vmem:[#allocation3 + $0x10] sm:$0xff] (!%p2268_p7)  }
  0x6f   : > { %s2051_s8 = scalar_select %p242_p4, %s1897_s19, 2 }
  0x70   : > { %249 = sbr.rel (%p2268_p7) target bundleno = 120 (0x78), region = 52  ;;  %378 = vst [vmem:[#allocation2] sm:$0xff] (!%p2268_p7), %v1611_v0  ;;  %379 = vst [vmem:[#allocation2 + $0x8] sm:$0xff] (!%p2268_p7), %v1612_v1  ;;  %v1614_v3 = vld [vmem:[#allocation3 + $0x18] sm:$0xff] (!%p2268_p7)   ;;  %v1615_v4 = vld [vmem:[#allocation3 + $0x20] sm:$0xff] (!%p2268_p7)  }
  0x71   : > { %s244_s28 = scalar_lea.vmem %s2250_s3, %s2051_s8  ;;  %380 = vst [vmem:[#allocation2 + $0x10] sm:$0xff] (!%p2268_p7), %v1613_v2  ;;  %381 = vst [vmem:[#allocation2 + $0x18] sm:$0xff] (!%p2268_p7), %v1614_v3  ;;  %v1616_v5 = vld [vmem:[#allocation3 + $0x28] sm:$0xff] (!%p2268_p7)   ;;  %v1617_v6 = vld [vmem:[#allocation3 + $0x30] sm:$0xff] (!%p2268_p7)  }
  0x72   : > { %382 = vst [vmem:[#allocation2 + $0x20] sm:$0xff] (!%p2268_p7), %v1615_v4  ;;  %383 = vst [vmem:[#allocation2 + $0x28] sm:$0xff] (!%p2268_p7), %v1616_v5  ;;  %v1618_v7 = vld [vmem:[#allocation3 + $0x38] sm:$0xff] (!%p2268_p7)   ;;  %v1619_v8 = vld [vmem:[#allocation3 + $0x40] sm:$0xff] (!%p2268_p7)  }
  0x73   : > { %384 = vst [vmem:[#allocation2 + $0x30] sm:$0xff] (!%p2268_p7), %v1617_v6  ;;  %385 = vst [vmem:[#allocation2 + $0x38] sm:$0xff] (!%p2268_p7), %v1618_v7  ;;  %v1620_v9 = vld [vmem:[#allocation3 + $0x48] sm:$0xff] (!%p2268_p7)   ;;  %v1621_v10 = vld [vmem:[#allocation3 + $0x50] sm:$0xff] (!%p2268_p7)  }
  0x74   : > { %386 = vst [vmem:[#allocation2 + $0x40] sm:$0xff] (!%p2268_p7), %v1619_v8  ;;  %387 = vst [vmem:[#allocation2 + $0x48] sm:$0xff] (!%p2268_p7), %v1620_v9  ;;  %v1622_v11 = vld [vmem:[#allocation3 + $0x58] sm:$0xff] (!%p2268_p7)   ;;  %v1623_v12 = vld [vmem:[#allocation3 + $0x60] sm:$0xff] (!%p2268_p7)  }
  0x75   : > { %388 = vst [vmem:[#allocation2 + $0x50] sm:$0xff] (!%p2268_p7), %v1621_v10  ;;  %389 = vst [vmem:[#allocation2 + $0x58] sm:$0xff] (!%p2268_p7), %v1622_v11  ;;  %v1624_v13 = vld [vmem:[#allocation3 + $0x68] sm:$0xff] (!%p2268_p7)   ;;  %v1625_v14 = vld [vmem:[#allocation3 + $0x70] sm:$0xff] (!%p2268_p7)  }
  0x76   : > { %390 = vst [vmem:[#allocation2 + $0x60] sm:$0xff] (!%p2268_p7), %v1623_v12  ;;  %391 = vst [vmem:[#allocation2 + $0x68] sm:$0xff] (!%p2268_p7), %v1624_v13  ;;  %v1626_v15 = vld [vmem:[#allocation3 + $0x78] sm:$0xff] (!%p2268_p7)  }
  0x77   : > { %392 = vst [vmem:[#allocation2 + $0x70] sm:$0xff] %v1625_v14  ;;  %393 = vst [vmem:[#allocation2 + $0x78] sm:$0xff] %v1626_v15 }
  0x78 PF: > { %v1627_v16 = vld [vmem:[%s2043_s7] sm:$0xff]   ;;  %v1628_v17 = vld [vmem:[%s2043_s7 + $0x8] sm:$0xff]   ;;  %v1629_v18 = vld [vmem:[%s2043_s7 + $0x10] sm:$0xff]   ;;  %p1332_p11 = scmp.ne.s32.totalorder %s1897_s19, 2 }
  0x79   : > { %1474 = vmatprep.subr.bf16.mxu0 %v1627_v16  ;;  %v1630_v19 = vld [vmem:[%s2043_s7 + $0x18] sm:$0xff]   ;;  %v394_v20 = vld [vmem:[#allocation2] sm:$0xff]  ;;  %v1632_v22 = vld [vmem:[%s2043_s7 + $0x28] sm:$0xff]  }
  0x7a   : > { %1475 = vmatpush3.bf16.msra.mxu0 %v1627_v16  ;;  %1490 = vmatprep.mubr.bf16.mxu0 %v394_v20  ;;  %v1631_v21 = vld [vmem:[%s2043_s7 + $0x20] sm:$0xff]   ;;  %v1633_v23 = vld [vmem:[%s2043_s7 + $0x30] sm:$0xff]   ;;  %v1634_v24 = vld [vmem:[%s2043_s7 + $0x38] sm:$0xff]  }
  0x7b   : > { %1476 = vmatprep.subr.bf16.mxu0 %v1628_v17  ;;  %v395_v25 = vld [vmem:[#allocation2 + $0x8] sm:$0xff]  ;;  %v396_v26 = vld [vmem:[#allocation2 + $0x10] sm:$0xff]  ;;  %v397_v27 = vld [vmem:[#allocation2 + $0x18] sm:$0xff] }
  0x7c   : > { %v398_v28 = vld [vmem:[#allocation2 + $0x20] sm:$0xff]  ;;  %v399_v29 = vld [vmem:[#allocation2 + $0x28] sm:$0xff]  ;;  %v400_v30 = vld [vmem:[#allocation2 + $0x30] sm:$0xff] }
  0x7d   : > { %v401_v31 = vld [vmem:[#allocation2 + $0x38] sm:$0xff]  ;;  %v402_v32 = vld [vmem:[#allocation2 + $0x40] sm:$0xff]  ;;  %v403_v33 = vld [vmem:[#allocation2 + $0x48] sm:$0xff] }
  0x7e   : > { %1477 = vmatpush3.bf16.msra.mxu0 %v1628_v17  ;;  %v404_v34 = vld [vmem:[#allocation2 + $0x50] sm:$0xff]  ;;  %v405_v35 = vld [vmem:[#allocation2 + $0x58] sm:$0xff]  ;;  %v406_v36 = vld [vmem:[#allocation2 + $0x60] sm:$0xff] }
  0x7f   : > { %1478 = vmatprep.subr.bf16.mxu0 %v1629_v18  ;;  %v407_v37 = vld [vmem:[#allocation2 + $0x68] sm:$0xff]  ;;  %v408_v38 = vld [vmem:[#allocation2 + $0x70] sm:$0xff]  ;;  %v409_v39 = vld [vmem:[#allocation2 + $0x78] sm:$0xff] }
  0x80   : > { %v1637_v40 = vld [vmem:[#allocation6 + $0x44] ss:$8 sps:$4 sm:$0xff]  }
  0x81   : > { %914 = vmatprep.mubr.bf16.mxu1 %v1637_v40  ;;  %v1661_v41 = vld [vmem:[#allocation6 + $0x4] ss:$8 sps:$4 sm:$0xff]  }
  0x82   : > { %1479 = vmatpush3.bf16.msra.mxu0 %v1629_v18  ;;  %v1647_v40 = vld [vmem:[#allocation6 + $0x84] ss:$8 sps:$4 sm:$0xff]  }
  0x83   : > { %1480 = vmatprep.subr.bf16.mxu0 %v1630_v19 }
  0x86   : > { %1481 = vmatpush3.bf16.msra.mxu0 %v1630_v19 }
  0x87   : > { %1482 = vmatprep.subr.bf16.mxu0 %v1631_v21 }
  0x8a   : > { %1483 = vmatpush3.bf16.msra.mxu0 %v1631_v21 }
  0x8b   : > { %1484 = vmatprep.subr.bf16.mxu0 %v1632_v22 }
  0x8e   : > { %1485 = vmatpush3.bf16.msra.mxu0 %v1632_v22 }
  0x8f   : > { %1486 = vmatprep.subr.bf16.mxu0 %v1633_v23 }
  0x92   : > { %1487 = vmatpush3.bf16.msra.mxu0 %v1633_v23 }
  0x93   : > { %1488 = vmatprep.subr.bf16.mxu0 %v1634_v24 }
  0x96   : > { %1489 = vmatpush3.bf16.msra.mxu0 %v1634_v24 }
  0x99   : > { %1491 = vmatmul.mubr.bf16.vlgmr.msra.gmra.mrb[0].mxu0 %v395_v25 }
  0x9a   : > { %1494 = vmatprep.mubr.bf16.mxu0 %v396_v26  ;;  %v1635_v26 = vld [vmem:[#allocation6 + $0x40] ss:$8 sps:$4 sm:$0xff]  }
  0xa1   : > { %1495 = vmatmul.mubr.bf16.gmra.mrb[4].mxu0 %v397_v27  ;;  %v1659_v27 = vld [vmem:[#allocation6] ss:$8 sps:$4 sm:$0xff]  }
  0xa2   : > { %1498 = vmatprep.mubr.bf16.mxu0 %v398_v28  ;;  %v1638_v28 = vld [vmem:[#allocation6 + $0x54] ss:$8 sps:$4 sm:$0xff]  }
  0xa9   : > { %1499 = vmatmul.mubr.bf16.gmra.mrb[8].mxu0 %v399_v29  ;;  %v1665_v29 = vld [vmem:[#allocation6 + $0x14] ss:$8 sps:$4 sm:$0xff]  }
  0xaa   : > { %1502 = vmatprep.mubr.bf16.mxu0 %v400_v30  ;;  %v1640_v30 = vld [vmem:[#allocation6 + $0x50] ss:$8 sps:$4 sm:$0xff]  }
  0xb1   : > { %1503 = vmatmul.mubr.bf16.gmra.mrb[12].mxu0 %v401_v31  ;;  %v1667_v31 = vld [vmem:[#allocation6 + $0x10] ss:$8 sps:$4 sm:$0xff]  }
  0xb2   : > { %1506 = vmatprep.mubr.bf16.mxu0 %v402_v32  ;;  %v1641_v32 = vld [vmem:[#allocation6 + $0x64] ss:$8 sps:$4 sm:$0xff]  }
  0xb9   : > { %1507 = vmatmul.mubr.bf16.gmra.mrb[16].mxu0 %v403_v33  ;;  %v1671_v33 = vld [vmem:[#allocation6 + $0x24] ss:$8 sps:$4 sm:$0xff]  }
  0xba   : > { %1510 = vmatprep.mubr.bf16.mxu0 %v404_v34  ;;  %v1643_v34 = vld [vmem:[#allocation6 + $0x60] ss:$8 sps:$4 sm:$0xff]  }
  0xc1   : > { %1511 = vmatmul.mubr.bf16.gmra.mrb[20].mxu0 %v405_v35  ;;  %v1673_v35 = vld [vmem:[#allocation6 + $0x20] ss:$8 sps:$4 sm:$0xff]  }
  0xc2   : > { %1514 = vmatprep.mubr.bf16.mxu0 %v406_v36  ;;  %v1644_v36 = vld [vmem:[#allocation6 + $0x74] ss:$8 sps:$4 sm:$0xff]  }
  0xc9   : > { %1515 = vmatmul.mubr.bf16.gmra.mrb[24].mxu0 %v407_v37  ;;  %v1677_v37 = vld [vmem:[#allocation6 + $0x34] ss:$8 sps:$4 sm:$0xff]  }
  0xca   : > { %1518 = vmatprep.mubr.bf16.mxu0 %v408_v38  ;;  %v1646_v38 = vld [vmem:[#allocation6 + $0x70] ss:$8 sps:$4 sm:$0xff]  }
  0xd1   : > { %1519 = vmatmul.mubr.bf16.gmra.mrb[28].mxu0 %v409_v39  ;;  %v1679_v39 = vld [vmem:[#allocation6 + $0x30] ss:$8 sps:$4 sm:$0xff]  }
  0xd2   : > { %882 = vmatprep.mubr.bf16.mxu0 %v1661_v41  ;;  %v1649_v41 = vld [vmem:[#allocation6 + $0x80] ss:$8 sps:$4 sm:$0xff]  }
 0x16c   : > { %v1492_v42 = vpop.f32.mrb[0].mxu0 }
 0x16d   : > { %v508_v43 = vpop.f32.mrb[1].mxu0 }
 0x16e   : > { %v1493_v44 = vpop.f32.mrb[2].mxu0 }
 0x16f   : > { %v636_v45 = vpack.c.bf16 %v1493_v44, %v1492_v42  ;;  %v511_v46 = vpop.f32.mrb[3].mxu0  ;;  %v1650_v42 = vld [vmem:[#allocation6 + $0x94] ss:$8 sps:$4 sm:$0xff]   ;;  %v1653_v44 = vld [vmem:[#allocation6 + $0xa4] ss:$8 sps:$4 sm:$0xff]  }
 0x170   : > { %v635_v47 = vpack.c.bf16 %v511_v46, %v508_v43  ;;  %v1652_v43 = vld [vmem:[#allocation6 + $0x90] ss:$8 sps:$4 sm:$0xff]   ;;  %v1656_v46 = vld [vmem:[#allocation6 + $0xb4] ss:$8 sps:$4 sm:$0xff]  }
 0x174   : > { %v1496_v48 = vpop.f32.mrb[4].mxu0 }
 0x175   : > { %v524_v49 = vpop.f32.mrb[5].mxu0 }
 0x176   : > { %v1497_v50 = vpop.f32.mrb[6].mxu0 }
 0x177   : > { %v638_v51 = vpack.c.bf16 %v1497_v50, %v1496_v48  ;;  %v527_v52 = vpop.f32.mrb[7].mxu0  ;;  %v1662_v48 = vld [vmem:[#allocation6 + $0xc4] ss:$8 sps:$4 sm:$0xff]   ;;  %v1668_v50 = vld [vmem:[#allocation6 + $0xd4] ss:$8 sps:$4 sm:$0xff]  }
 0x178   : > { %v637_v53 = vpack.c.bf16 %v527_v52, %v524_v49  ;;  %v1664_v49 = vld [vmem:[#allocation6 + $0xc0] ss:$8 sps:$4 sm:$0xff]   ;;  %v1674_v52 = vld [vmem:[#allocation6 + $0xe4] ss:$8 sps:$4 sm:$0xff]  }
 0x17c   : > { %v1500_v54 = vpop.f32.mrb[8].mxu0 }
 0x17d   : > { %v540_v55 = vpop.f32.mrb[9].mxu0 }
 0x17e   : > { %v1501_v56 = vpop.f32.mrb[10].mxu0 }
 0x17f   : > { %v640_v57 = vpack.c.bf16 %v1501_v56, %v1500_v54  ;;  %v543_v58 = vpop.f32.mrb[11].mxu0  ;;  %v1680_v54 = vld [vmem:[#allocation6 + $0xf4] ss:$8 sps:$4 sm:$0xff]  }
 0x180   : > { %v639_v59 = vpack.c.bf16 %v543_v58, %v540_v55  ;;  %v1682_v55 = vld [vmem:[#allocation6 + $0xf0] ss:$8 sps:$4 sm:$0xff]   ;;  %v2072_v58 = vld [vmem:[%s244_s28] ss:$0 sm:$0xff] }
 0x184   : > { %v1504_v60 = vpop.f32.mrb[12].mxu0 }
 0x185   : > { %v556_v61 = vpop.f32.mrb[13].mxu0 }
 0x186   : > { %v1505_v62 = vpop.f32.mrb[14].mxu0 }
 0x187   : > { %v642_v63 = vpack.c.bf16 %v1505_v62, %v1504_v60  ;;  %v559_v0 = vpop.f32.mrb[15].mxu0 }
 0x188   : > { %v641_v1 = vpack.c.bf16 %v559_v0, %v556_v61 }
 0x18c   : > { %v1508_v2 = vpop.f32.mrb[16].mxu0 }
 0x18d   : > { %v572_v3 = vpop.f32.mrb[17].mxu0 }
 0x18e   : > { %v1509_v4 = vpop.f32.mrb[18].mxu0 }
 0x18f   : > { %v644_v5 = vpack.c.bf16 %v1509_v4, %v1508_v2  ;;  %v575_v6 = vpop.f32.mrb[19].mxu0 }
 0x190   : > { %v643_v7 = vpack.c.bf16 %v575_v6, %v572_v3 }
 0x192   : > { %1362 = vmatprep.subr.bf16.mxu0 %v643_v7  ;;  %1522 = vmatprep.subr.bf16.mxu1 %v643_v7 }
 0x193   : > { %1363 = vmatpush3.bf16.msra.mxu0 %v635_v47  ;;  %1530 = vmatpush3.bf16.msra.mxu1 %v635_v47  ;;  %v1658_v47 = vld [vmem:[#allocation6 + $0xb0] ss:$8 sps:$4 sm:$0xff]  }
 0x194   : > { %v1512_v8 = vpop.f32.mrb[20].mxu0  ;;  %1364 = vmatprep.subr.bf16.mxu0 %v644_v5  ;;  %1523 = vmatprep.subr.bf16.mxu1 %v644_v5 }
 0x195   : > { %v588_v9 = vpop.f32.mrb[21].mxu0 }
 0x196   : > { %v1513_v10 = vpop.f32.mrb[22].mxu0 }
 0x197   : > { %v646_v11 = vpack.c.bf16 %v1513_v10, %v1512_v8  ;;  %v591_v12 = vpop.f32.mrb[23].mxu0  ;;  %1365 = vmatpush3.bf16.msra.mxu0 %v636_v45  ;;  %1531 = vmatpush3.bf16.msra.mxu1 %v636_v45  ;;  %v1655_v45 = vld [vmem:[#allocation6 + $0xa0] ss:$8 sps:$4 sm:$0xff]  }
 0x198   : > { %v645_v13 = vpack.c.bf16 %v591_v12, %v588_v9 }
 0x19a   : > { %1366 = vmatprep.subr.bf16.mxu0 %v645_v13  ;;  %1524 = vmatprep.subr.bf16.mxu1 %v645_v13 }
 0x19b   : > { %1367 = vmatpush3.bf16.msra.mxu0 %v637_v53  ;;  %1532 = vmatpush3.bf16.msra.mxu1 %v637_v53  ;;  %v1676_v53 = vld [vmem:[#allocation6 + $0xe0] ss:$8 sps:$4 sm:$0xff]  }
 0x19c   : > { %v1516_v14 = vpop.f32.mrb[24].mxu0  ;;  %1368 = vmatprep.subr.bf16.mxu0 %v646_v11  ;;  %1525 = vmatprep.subr.bf16.mxu1 %v646_v11 }
 0x19d   : > { %v604_v15 = vpop.f32.mrb[25].mxu0 }
 0x19e   : > { %v1517_v16 = vpop.f32.mrb[26].mxu0 }
 0x19f   : > { %v648_v17 = vpack.c.bf16 %v1517_v16, %v1516_v14  ;;  %v607_v18 = vpop.f32.mrb[27].mxu0  ;;  %1369 = vmatpush3.bf16.msra.mxu0 %v638_v51  ;;  %1533 = vmatpush3.bf16.msra.mxu1 %v638_v51  ;;  %v1670_v51 = vld [vmem:[#allocation6 + $0xd0] ss:$8 sps:$4 sm:$0xff]  }
 0x1a0   : > { %v647_v19 = vpack.c.bf16 %v607_v18, %v604_v15 }
 0x1a2   : > { %1370 = vmatprep.subr.bf16.mxu0 %v647_v19  ;;  %1526 = vmatprep.subr.bf16.mxu1 %v647_v19 }
 0x1a3   : > { %1371 = vmatpush3.bf16.msra.mxu0 %v639_v59  ;;  %1534 = vmatpush3.bf16.msra.mxu1 %v639_v59 }
 0x1a4   : > { %v1520_v20 = vpop.f32.mrb[28].mxu0  ;;  %1372 = vmatprep.subr.bf16.mxu0 %v648_v17  ;;  %1527 = vmatprep.subr.bf16.mxu1 %v648_v17 }
 0x1a5   : > { %v620_v21 = vpop.f32.mrb[29].mxu0 }
 0x1a6   : > { %v1521_v22 = vpop.f32.mrb[30].mxu0 }
 0x1a7   : > { %v650_v23 = vpack.c.bf16 %v1521_v22, %v1520_v20  ;;  %v623_v24 = vpop.f32.mrb[31].mxu0  ;;  %1373 = vmatpush3.bf16.msra.mxu0 %v640_v57  ;;  %1535 = vmatpush3.bf16.msra.mxu1 %v640_v57 }
 0x1a8   : > { %v649_v25 = vpack.c.bf16 %v623_v24, %v620_v21 }
 0x1aa   : > { %1374 = vmatprep.subr.bf16.mxu0 %v649_v25  ;;  %1528 = vmatprep.subr.bf16.mxu1 %v649_v25 }
 0x1ab   : > { %1375 = vmatpush3.bf16.msra.mxu0 %v641_v1  ;;  %1536 = vmatpush3.bf16.msra.mxu1 %v641_v1 }
 0x1ac   : > { %1376 = vmatprep.subr.bf16.mxu0 %v650_v23  ;;  %1529 = vmatprep.subr.bf16.mxu1 %v650_v23 }
 0x1af   : > { %1377 = vmatpush3.bf16.msra.mxu0 %v642_v63  ;;  %1537 = vmatpush3.bf16.msra.mxu1 %v642_v63 }
 0x1b2   : > { %915 = vmatmul.mubr.bf16.vlgmr.msra.gmra.mrb[0].mxu1 %v1635_v26  ;;  %883 = vmatmul.mubr.bf16.vlgmr.msra.gmra.mrb[32].mxu0 %v1659_v27 }
 0x1b3   : > { %922 = vmatprep.mubr.bf16.mxu1 %v1638_v28  ;;  %890 = vmatprep.mubr.bf16.mxu0 %v1665_v29 }
 0x1ba   : > { %923 = vmatmul.mubr.bf16.gmra.mrb[4].mxu1 %v1640_v30  ;;  %891 = vmatmul.mubr.bf16.gmra.mrb[36].mxu0 %v1667_v31 }
 0x1bb   : > { %930 = vmatprep.mubr.bf16.mxu1 %v1641_v32  ;;  %898 = vmatprep.mubr.bf16.mxu0 %v1671_v33 }
 0x1c2   : > { %931 = vmatmul.mubr.bf16.gmra.mrb[8].mxu1 %v1643_v34  ;;  %899 = vmatmul.mubr.bf16.gmra.mrb[40].mxu0 %v1673_v35 }
 0x1c3   : > { %938 = vmatprep.mubr.bf16.mxu1 %v1644_v36  ;;  %906 = vmatprep.mubr.bf16.mxu0 %v1677_v37 }
 0x1ca   : > { %939 = vmatmul.mubr.bf16.gmra.mrb[12].mxu1 %v1646_v38  ;;  %907 = vmatmul.mubr.bf16.gmra.mrb[44].mxu0 %v1679_v39 }
 0x1cb   : > { %946 = vmatprep.mubr.bf16.mxu1 %v1647_v40 }
 0x1d2   : > { %947 = vmatmul.mubr.bf16.gmra.mrb[16].mxu1 %v1649_v41 }
 0x1d3   : > { %954 = vmatprep.mubr.bf16.mxu1 %v1650_v42 }
 0x1da   : > { %955 = vmatmul.mubr.bf16.gmra.mrb[20].mxu1 %v1652_v43 }
 0x1db   : > { %962 = vmatprep.mubr.bf16.mxu1 %v1653_v44 }
 0x1e2   : > { %963 = vmatmul.mubr.bf16.gmra.mrb[24].mxu1 %v1655_v45 }
 0x1e3   : > { %970 = vmatprep.mubr.bf16.mxu1 %v1656_v46 }
 0x1ea   : > { %971 = vmatmul.mubr.bf16.gmra.mrb[28].mxu1 %v1658_v47 }
 0x1eb   : > { %978 = vmatprep.mubr.bf16.mxu1 %v1662_v48 }
 0x1f2   : > { %979 = vmatmul.mubr.bf16.gmra.mrb[32].mxu1 %v1664_v49 }
 0x1f3   : > { %986 = vmatprep.mubr.bf16.mxu1 %v1668_v50 }
 0x1fa   : > { %987 = vmatmul.mubr.bf16.gmra.mrb[36].mxu1 %v1670_v51 }
 0x1fb   : > { %994 = vmatprep.mubr.bf16.mxu1 %v1674_v52 }
 0x202   : > { %995 = vmatmul.mubr.bf16.gmra.mrb[40].mxu1 %v1676_v53 }
 0x203   : > { %1002 = vmatprep.mubr.bf16.mxu1 %v1680_v54 }
 0x20a   : > { %1003 = vmatmul.mubr.bf16.gmra.mrb[44].mxu1 %v1682_v55 }
 0x285   : > { %v1402_v56 = vpop.f32.mrb[0].mxu1  ;;  %v1378_v57 = vpop.f32.mrb[32].mxu0 }
 0x286   : > { %v1403_v59 = vpop.f32.mrb[1].mxu1  ;;  %v1379_v60 = vpop.f32.mrb[33].mxu0 }
 0x287   : > { %v1404_v61 = vadd.f32 %v1403_v59, %v1402_v56  ;;  %v1405_v62 = vpop.f32.mrb[2].mxu1  ;;  %v1380_v63 = vadd.f32 %v1379_v60, %v1378_v57  ;;  %v1381_v0 = vpop.f32.mrb[34].mxu0 }
 0x288   : > { %v1406_v1 = vpop.f32.mrb[3].mxu1  ;;  %v1382_v2 = vpop.f32.mrb[35].mxu0 }
 0x289   : > { %v917_v3 = vadd.f32 %v1404_v61, %v2072_v58  ;;  %v1407_v4 = vadd.f32 %v1406_v1, %v1405_v62  ;;  %v885_v5 = vadd.f32 %v1380_v63, %v2072_v58  ;;  %v1383_v6 = vadd.f32 %v1382_v2, %v1381_v0 }
 0x28b   : > { %v1051_v7 = vmul.f32 0.25, %v917_v3  ;;  %v920_v8 = vadd.f32 %v1407_v4, %v2072_v58  ;;  %vm1011_vm0 = vcmp.gt.f32.partialorder %v885_v5, 0.0  ;;  %vm1019_vm1 = vcmp.gt.f32.partialorder %v917_v3, 0.0 }
 0x28c   : > { %v1043_v9 = vmul.f32 0.25, %v885_v5  ;;  %v888_v10 = vadd.f32 %v1383_v6, %v2072_v58 }
 0x28d   : > { %vm1020_vm2 = vcmp.gt.f32.partialorder %v920_v8, 0.0  ;;  %v1052_v11 = vmul.f32 0.25, %v920_v8  ;;  %v1408_v12 = vpop.f32.mrb[4].mxu1  ;;  %v1384_v13 = vpop.f32.mrb[36].mxu0  ;;  %v2080_v18 = vsel %vm1019_vm1, %v917_v3, %v1051_v7 }
 0x28e   : > { %v1409_v14 = vpop.f32.mrb[5].mxu1  ;;  %v2078_v15 = vsel %vm1011_vm0, %v885_v5, %v1043_v9  ;;  %vm1012_vm3 = vcmp.gt.f32.partialorder %v888_v10, 0.0  ;;  %v1044_v16 = vmul.f32 0.25, %v888_v10  ;;  %v1385_v17 = vpop.f32.mrb[37].mxu0  ;;  %1151 = vst [vmem:[#allocation9 + $0x40] sm:$0xff] (!%p1332_p11), %v2080_v18 }
 0x28f   : > { %v2082_v19 = vsel %vm1020_vm2, %v920_v8, %v1052_v11  ;;  %v1410_v20 = vadd.f32 %v1409_v14, %v1408_v12  ;;  %v1411_v21 = vpop.f32.mrb[6].mxu1  ;;  %v1386_v22 = vadd.f32 %v1385_v17, %v1384_v13  ;;  %v1387_v23 = vpop.f32.mrb[38].mxu0  ;;  %1143 = vst [vmem:[#allocation9] sm:$0xff] (!%p1332_p11), %v2078_v15 }
 0x290   : > { %v1111_v24 = vpack.c.bf16 %v2082_v19, %v2080_v18  ;;  %v1412_v25 = vpop.f32.mrb[7].mxu1  ;;  %v2086_v26 = vsel %vm1012_vm3, %v888_v10, %v1044_v16  ;;  %v1388_v27 = vpop.f32.mrb[39].mxu0  ;;  %1152 = vst [vmem:[#allocation9 + $0x48] sm:$0xff] (!%p1332_p11), %v2082_v19 }
 0x291   : > { %v925_v28 = vadd.f32 %v1410_v20, %v2072_v58  ;;  %v1413_v29 = vadd.f32 %v1412_v25, %v1411_v21  ;;  %v1107_v30 = vpack.c.bf16 %v2086_v26, %v2078_v15  ;;  %v893_v31 = vadd.f32 %v1386_v22, %v2072_v58  ;;  %1144 = vst [vmem:[#allocation9 + $0x8] sm:$0xff] (!%p1332_p11), %v2086_v26 }
 0x292   : > { %1127 = vst [vmem:[#allocation2 + $0x20] sm:$0xff] %v1111_v24  ;;  %v1389_v32 = vadd.f32 %v1388_v27, %v1387_v23 }
 0x293   : > { %v1053_v33 = vmul.f32 0.25, %v925_v28  ;;  %v928_v34 = vadd.f32 %v1413_v29, %v2072_v58  ;;  %1123 = vst [vmem:[#allocation2] sm:$0xff] %v1107_v30  ;;  %vm1013_vm4 = vcmp.gt.f32.partialorder %v893_v31, 0.0  ;;  %vm1021_vm5 = vcmp.gt.f32.partialorder %v925_v28, 0.0 }
 0x294   : > { %v1045_v35 = vmul.f32 0.25, %v893_v31  ;;  %v896_v36 = vadd.f32 %v1389_v32, %v2072_v58 }
 0x295   : > { %vm1022_vm6 = vcmp.gt.f32.partialorder %v928_v34, 0.0  ;;  %v1054_v37 = vmul.f32 0.25, %v928_v34  ;;  %v1414_v38 = vpop.f32.mrb[8].mxu1  ;;  %v1390_v39 = vpop.f32.mrb[40].mxu0  ;;  %v2096_v44 = vsel %vm1021_vm5, %v925_v28, %v1053_v33 }
 0x296   : > { %v1415_v40 = vpop.f32.mrb[9].mxu1  ;;  %v2094_v41 = vsel %vm1013_vm4, %v893_v31, %v1045_v35  ;;  %vm1014_vm7 = vcmp.gt.f32.partialorder %v896_v36, 0.0  ;;  %v1046_v42 = vmul.f32 0.25, %v896_v36  ;;  %v1391_v43 = vpop.f32.mrb[41].mxu0  ;;  %1153 = vst [vmem:[#allocation9 + $0x50] sm:$0xff] (!%p1332_p11), %v2096_v44 }
 0x297   : > { %v2098_v45 = vsel %vm1022_vm6, %v928_v34, %v1054_v37  ;;  %v1416_v46 = vadd.f32 %v1415_v40, %v1414_v38  ;;  %v1417_v47 = vpop.f32.mrb[10].mxu1  ;;  %v1392_v48 = vadd.f32 %v1391_v43, %v1390_v39  ;;  %v1393_v49 = vpop.f32.mrb[42].mxu0  ;;  %1145 = vst [vmem:[#allocation9 + $0x10] sm:$0xff] (!%p1332_p11), %v2094_v41 }
 0x298   : > { %v1112_v50 = vpack.c.bf16 %v2098_v45, %v2096_v44  ;;  %v1418_v51 = vpop.f32.mrb[11].mxu1  ;;  %v2102_v52 = vsel %vm1014_vm7, %v896_v36, %v1046_v42  ;;  %v1394_v53 = vpop.f32.mrb[43].mxu0  ;;  %1154 = vst [vmem:[#allocation9 + $0x58] sm:$0xff] (!%p1332_p11), %v2098_v45 }
 0x299   : > { %v933_v54 = vadd.f32 %v1416_v46, %v2072_v58  ;;  %v1419_v55 = vadd.f32 %v1418_v51, %v1417_v47  ;;  %v1108_v56 = vpack.c.bf16 %v2102_v52, %v2094_v41  ;;  %v901_v57 = vadd.f32 %v1392_v48, %v2072_v58  ;;  %1146 = vst [vmem:[#allocation9 + $0x18] sm:$0xff] (!%p1332_p11), %v2102_v52 }
 0x29a   : > { %1128 = vst [vmem:[#allocation2 + $0x28] sm:$0xff] %v1112_v50  ;;  %v1395_v59 = vadd.f32 %v1394_v53, %v1393_v49 }
 0x29b   : > { %v1055_v60 = vmul.f32 0.25, %v933_v54  ;;  %v936_v61 = vadd.f32 %v1419_v55, %v2072_v58  ;;  %1124 = vst [vmem:[#allocation2 + $0x8] sm:$0xff] %v1108_v56  ;;  %vm1015_vm8 = vcmp.gt.f32.partialorder %v901_v57, 0.0  ;;  %vm1023_vm9 = vcmp.gt.f32.partialorder %v933_v54, 0.0 }
 0x29c   : > { %v1047_v62 = vmul.f32 0.25, %v901_v57  ;;  %v904_v63 = vadd.f32 %v1395_v59, %v2072_v58 }
 0x29d   : > { %vm1024_vm10 = vcmp.gt.f32.partialorder %v936_v61, 0.0  ;;  %v1056_v0 = vmul.f32 0.25, %v936_v61  ;;  %v1420_v1 = vpop.f32.mrb[12].mxu1  ;;  %v1396_v2 = vpop.f32.mrb[44].mxu0  ;;  %v2112_v7 = vsel %vm1023_vm9, %v933_v54, %v1055_v60 }
 0x29e   : > { %v1421_v3 = vpop.f32.mrb[13].mxu1  ;;  %v2110_v4 = vsel %vm1015_vm8, %v901_v57, %v1047_v62  ;;  %vm1016_vm11 = vcmp.gt.f32.partialorder %v904_v63, 0.0  ;;  %v1048_v5 = vmul.f32 0.25, %v904_v63  ;;  %v1397_v6 = vpop.f32.mrb[45].mxu0  ;;  %1155 = vst [vmem:[#allocation9 + $0x60] sm:$0xff] (!%p1332_p11), %v2112_v7 }
 0x29f   : > { %v2114_v8 = vsel %vm1024_vm10, %v936_v61, %v1056_v0  ;;  %v1422_v9 = vadd.f32 %v1421_v3, %v1420_v1  ;;  %v1423_v10 = vpop.f32.mrb[14].mxu1  ;;  %v1398_v11 = vadd.f32 %v1397_v6, %v1396_v2  ;;  %v1399_v12 = vpop.f32.mrb[46].mxu0  ;;  %1147 = vst [vmem:[#allocation9 + $0x20] sm:$0xff] (!%p1332_p11), %v2110_v4 }
 0x2a0   : > { %v1113_v13 = vpack.c.bf16 %v2114_v8, %v2112_v7  ;;  %v1424_v14 = vpop.f32.mrb[15].mxu1  ;;  %v2118_v16 = vsel %vm1016_vm11, %v904_v63, %v1048_v5  ;;  %v1400_v17 = vpop.f32.mrb[47].mxu0  ;;  %1156 = vst [vmem:[#allocation9 + $0x68] sm:$0xff] (!%p1332_p11), %v2114_v8 }
 0x2a1   : > { %v941_v20 = vadd.f32 %v1422_v9, %v2072_v58  ;;  %v1425_v21 = vadd.f32 %v1424_v14, %v1423_v10  ;;  %v1109_v22 = vpack.c.bf16 %v2118_v16, %v2110_v4  ;;  %v909_v23 = vadd.f32 %v1398_v11, %v2072_v58  ;;  %1148 = vst [vmem:[#allocation9 + $0x28] sm:$0xff] (!%p1332_p11), %v2118_v16 }
 0x2a2   : > { %1129 = vst [vmem:[#allocation2 + $0x30] sm:$0xff] %v1113_v13  ;;  %v1401_v24 = vadd.f32 %v1400_v17, %v1399_v12 }
 0x2a3   : > { %v1057_v25 = vmul.f32 0.25, %v941_v20  ;;  %v944_v27 = vadd.f32 %v1425_v21, %v2072_v58  ;;  %1125 = vst [vmem:[#allocation2 + $0x10] sm:$0xff] %v1109_v22  ;;  %vm1017_vm12 = vcmp.gt.f32.partialorder %v909_v23, 0.0  ;;  %vm1025_vm13 = vcmp.gt.f32.partialorder %v941_v20, 0.0 }
 0x2a4   : > { %v1049_v28 = vmul.f32 0.25, %v909_v23  ;;  %v912_v29 = vadd.f32 %v1401_v24, %v2072_v58 }
 0x2a5   : > { %vm1026_vm14 = vcmp.gt.f32.partialorder %v944_v27, 0.0  ;;  %v1058_v30 = vmul.f32 0.25, %v944_v27  ;;  %v1426_v31 = vpop.f32.mrb[16].mxu1  ;;  %v2128_v35 = vsel %vm1025_vm13, %v941_v20, %v1057_v25 }
 0x2a6   : > { %v1427_v32 = vpop.f32.mrb[17].mxu1  ;;  %v2126_v33 = vsel %vm1017_vm12, %v909_v23, %v1049_v28  ;;  %vm1018_vm15 = vcmp.gt.f32.partialorder %v912_v29, 0.0  ;;  %v1050_v34 = vmul.f32 0.25, %v912_v29  ;;  %1157 = vst [vmem:[#allocation9 + $0x70] sm:$0xff] (!%p1332_p11), %v2128_v35 }
 0x2a7   : > { %v2130_v36 = vsel %vm1026_vm14, %v944_v27, %v1058_v30  ;;  %v1428_v37 = vadd.f32 %v1427_v32, %v1426_v31  ;;  %v1429_v38 = vpop.f32.mrb[18].mxu1  ;;  %1149 = vst [vmem:[#allocation9 + $0x30] sm:$0xff] (!%p1332_p11), %v2126_v33 }
 0x2a8   : > { %v1114_v39 = vpack.c.bf16 %v2130_v36, %v2128_v35  ;;  %v1430_v40 = vpop.f32.mrb[19].mxu1  ;;  %v2134_v42 = vsel %vm1018_vm15, %v912_v29, %v1050_v34  ;;  %1158 = vst [vmem:[#allocation9 + $0x78] sm:$0xff] (!%p1332_p11), %v2130_v36 }
 0x2a9   : > { %v949_v43 = vadd.f32 %v1428_v37, %v2072_v58  ;;  %v1431_v46 = vadd.f32 %v1430_v40, %v1429_v38  ;;  %v1110_v47 = vpack.c.bf16 %v2134_v42, %v2126_v33  ;;  %1150 = vst [vmem:[#allocation9 + $0x38] sm:$0xff] (!%p1332_p11), %v2134_v42 }
 0x2aa   : > { %1130 = vst [vmem:[#allocation2 + $0x38] sm:$0xff] %v1114_v39 }
 0x2ab   : > { %v1059_v48 = vmul.f32 0.25, %v949_v43  ;;  %v952_v49 = vadd.f32 %v1431_v46, %v2072_v58  ;;  %1126 = vst [vmem:[#allocation2 + $0x18] sm:$0xff] %v1110_v47  ;;  %vm1027_vm0 = vcmp.gt.f32.partialorder %v949_v43, 0.0 }
 0x2ad   : > { %vm1028_vm1 = vcmp.gt.f32.partialorder %v952_v49, 0.0  ;;  %v1060_v50 = vmul.f32 0.25, %v952_v49  ;;  %v1432_v51 = vpop.f32.mrb[20].mxu1  ;;  %v2140_v54 = vsel %vm1027_vm0, %v949_v43, %v1059_v48 }
 0x2ae   : > { %v1433_v53 = vpop.f32.mrb[21].mxu1  ;;  %1159 = vst [vmem:[#allocation9 + $0x80] sm:$0xff] (!%p1332_p11), %v2140_v54 }
 0x2af   : > { %v2142_v55 = vsel %vm1028_vm1, %v952_v49, %v1060_v50  ;;  %v1434_v56 = vadd.f32 %v1433_v53, %v1432_v51  ;;  %v1435_v57 = vpop.f32.mrb[22].mxu1 }
 0x2b0   : > { %v1115_v59 = vpack.c.bf16 %v2142_v55, %v2140_v54  ;;  %v1436_v60 = vpop.f32.mrb[23].mxu1  ;;  %1160 = vst [vmem:[#allocation9 + $0x88] sm:$0xff] (!%p1332_p11), %v2142_v55 }
 0x2b1   : > { %v957_v61 = vadd.f32 %v1434_v56, %v2072_v58  ;;  %v1437_v62 = vadd.f32 %v1436_v60, %v1435_v57 }
 0x2b2   : > { %1131 = vst [vmem:[#allocation2 + $0x40] sm:$0xff] %v1115_v59 }
 0x2b3   : > { %v1061_v63 = vmul.f32 0.25, %v957_v61  ;;  %v960_v0 = vadd.f32 %v1437_v62, %v2072_v58  ;;  %vm1029_vm2 = vcmp.gt.f32.partialorder %v957_v61, 0.0 }
 0x2b5   : > { %vm1030_vm3 = vcmp.gt.f32.partialorder %v960_v0, 0.0  ;;  %v1062_v1 = vmul.f32 0.25, %v960_v0  ;;  %v1438_v2 = vpop.f32.mrb[24].mxu1  ;;  %v2148_v5 = vsel %vm1029_vm2, %v957_v61, %v1061_v63 }
 0x2b6   : > { %v1439_v3 = vpop.f32.mrb[25].mxu1  ;;  %1161 = vst [vmem:[#allocation9 + $0x90] sm:$0xff] (!%p1332_p11), %v2148_v5 }
 0x2b7   : > { %v2150_v6 = vsel %vm1030_vm3, %v960_v0, %v1062_v1  ;;  %v1440_v9 = vadd.f32 %v1439_v3, %v1438_v2  ;;  %v1441_v10 = vpop.f32.mrb[26].mxu1 }
 0x2b8   : > { %v1116_v11 = vpack.c.bf16 %v2150_v6, %v2148_v5  ;;  %v1442_v12 = vpop.f32.mrb[27].mxu1  ;;  %1162 = vst [vmem:[#allocation9 + $0x98] sm:$0xff] (!%p1332_p11), %v2150_v6 }
 0x2b9   : > { %v965_v13 = vadd.f32 %v1440_v9, %v2072_v58  ;;  %v1443_v14 = vadd.f32 %v1442_v12, %v1441_v10 }
 0x2ba   : > { %1132 = vst [vmem:[#allocation2 + $0x48] sm:$0xff] %v1116_v11 }
 0x2bb   : > { %v1063_v17 = vmul.f32 0.25, %v965_v13  ;;  %v968_v20 = vadd.f32 %v1443_v14, %v2072_v58  ;;  %vm1031_vm4 = vcmp.gt.f32.partialorder %v965_v13, 0.0 }
 0x2bd   : > { %vm1032_vm5 = vcmp.gt.f32.partialorder %v968_v20, 0.0  ;;  %v1064_v21 = vmul.f32 0.25, %v968_v20  ;;  %v1444_v22 = vpop.f32.mrb[28].mxu1  ;;  %v2156_v24 = vsel %vm1031_vm4, %v965_v13, %v1063_v17 }
 0x2be   : > { %v1445_v23 = vpop.f32.mrb[29].mxu1  ;;  %1163 = vst [vmem:[#allocation9 + $0xa0] sm:$0xff] (!%p1332_p11), %v2156_v24 }
 0x2bf   : > { %v2158_v25 = vsel %vm1032_vm5, %v968_v20, %v1064_v21  ;;  %v1446_v27 = vadd.f32 %v1445_v23, %v1444_v22  ;;  %v1447_v28 = vpop.f32.mrb[30].mxu1 }
 0x2c0   : > { %v1117_v29 = vpack.c.bf16 %v2158_v25, %v2156_v24  ;;  %v1448_v30 = vpop.f32.mrb[31].mxu1  ;;  %1164 = vst [vmem:[#allocation9 + $0xa8] sm:$0xff] (!%p1332_p11), %v2158_v25 }
 0x2c1   : > { %v973_v31 = vadd.f32 %v1446_v27, %v2072_v58  ;;  %v1449_v32 = vadd.f32 %v1448_v30, %v1447_v28 }
 0x2c2   : > { %1133 = vst [vmem:[#allocation2 + $0x50] sm:$0xff] %v1117_v29 }
 0x2c3   : > { %v1065_v34 = vmul.f32 0.25, %v973_v31  ;;  %v976_v37 = vadd.f32 %v1449_v32, %v2072_v58  ;;  %vm1033_vm6 = vcmp.gt.f32.partialorder %v973_v31, 0.0 }
 0x2c5   : > { %vm1034_vm7 = vcmp.gt.f32.partialorder %v976_v37, 0.0  ;;  %v1066_v38 = vmul.f32 0.25, %v976_v37  ;;  %v1450_v39 = vpop.f32.mrb[32].mxu1  ;;  %v2164_v43 = vsel %vm1033_vm6, %v973_v31, %v1065_v34 }
 0x2c6   : > { %v1451_v40 = vpop.f32.mrb[33].mxu1  ;;  %1165 = vst [vmem:[#allocation9 + $0xb0] sm:$0xff] (!%p1332_p11), %v2164_v43 }
 0x2c7   : > { %v2166_v46 = vsel %vm1034_vm7, %v976_v37, %v1066_v38  ;;  %v1452_v47 = vadd.f32 %v1451_v40, %v1450_v39  ;;  %v1453_v48 = vpop.f32.mrb[34].mxu1 }
 0x2c8   : > { %v1118_v49 = vpack.c.bf16 %v2166_v46, %v2164_v43  ;;  %v1454_v50 = vpop.f32.mrb[35].mxu1  ;;  %1166 = vst [vmem:[#allocation9 + $0xb8] sm:$0xff] (!%p1332_p11), %v2166_v46 }
 0x2c9   : > { %v981_v51 = vadd.f32 %v1452_v47, %v2072_v58  ;;  %v1455_v53 = vadd.f32 %v1454_v50, %v1453_v48 }
 0x2ca   : > { %1134 = vst [vmem:[#allocation2 + $0x58] sm:$0xff] %v1118_v49 }
 0x2cb   : > { %v1067_v56 = vmul.f32 0.25, %v981_v51  ;;  %v984_v57 = vadd.f32 %v1455_v53, %v2072_v58  ;;  %vm1035_vm8 = vcmp.gt.f32.partialorder %v981_v51, 0.0 }
 0x2cd   : > { %vm1036_vm9 = vcmp.gt.f32.partialorder %v984_v57, 0.0  ;;  %v1068_v59 = vmul.f32 0.25, %v984_v57  ;;  %v1456_v60 = vpop.f32.mrb[36].mxu1  ;;  %v2172_v62 = vsel %vm1035_vm8, %v981_v51, %v1067_v56 }
 0x2ce   : > { %v1457_v61 = vpop.f32.mrb[37].mxu1  ;;  %1167 = vst [vmem:[#allocation9 + $0xc0] sm:$0xff] (!%p1332_p11), %v2172_v62 }
 0x2cf   : > { %v2174_v63 = vsel %vm1036_vm9, %v984_v57, %v1068_v59  ;;  %v1458_v0 = vadd.f32 %v1457_v61, %v1456_v60  ;;  %v1459_v1 = vpop.f32.mrb[38].mxu1 }
 0x2d0   : > { %v1119_v2 = vpack.c.bf16 %v2174_v63, %v2172_v62  ;;  %v1460_v3 = vpop.f32.mrb[39].mxu1  ;;  %1168 = vst [vmem:[#allocation9 + $0xc8] sm:$0xff] (!%p1332_p11), %v2174_v63 }
 0x2d1   : > { %v989_v9 = vadd.f32 %v1458_v0, %v2072_v58  ;;  %v1461_v10 = vadd.f32 %v1460_v3, %v1459_v1 }
 0x2d2   : > { %1135 = vst [vmem:[#allocation2 + $0x60] sm:$0xff] %v1119_v2 }
 0x2d3   : > { %v1069_v11 = vmul.f32 0.25, %v989_v9  ;;  %v992_v12 = vadd.f32 %v1461_v10, %v2072_v58  ;;  %vm1037_vm10 = vcmp.gt.f32.partialorder %v989_v9, 0.0 }
 0x2d5   : > { %vm1038_vm11 = vcmp.gt.f32.partialorder %v992_v12, 0.0  ;;  %v1070_v13 = vmul.f32 0.25, %v992_v12  ;;  %v1462_v14 = vpop.f32.mrb[40].mxu1  ;;  %v1101_v20 = vsel %vm1037_vm10, %v989_v9, %v1069_v11 }
 0x2d6   : > { %v1463_v17 = vpop.f32.mrb[41].mxu1  ;;  %1169 = vst [vmem:[#allocation9 + $0xd0] sm:$0xff] (!%p1332_p11), %v1101_v20 }
 0x2d7   : > { %v1102_v21 = vsel %vm1038_vm11, %v992_v12, %v1070_v13  ;;  %v1464_v22 = vadd.f32 %v1463_v17, %v1462_v14  ;;  %v1465_v23 = vpop.f32.mrb[42].mxu1 }
 0x2d8   : > { %v1120_v27 = vpack.c.bf16 %v1102_v21, %v1101_v20  ;;  %v1466_v28 = vpop.f32.mrb[43].mxu1  ;;  %1170 = vst [vmem:[#allocation9 + $0xd8] sm:$0xff] (!%p1332_p11), %v1102_v21 }
 0x2d9   : > { %v997_v29 = vadd.f32 %v1464_v22, %v2072_v58  ;;  %v1467_v30 = vadd.f32 %v1466_v28, %v1465_v23 }
 0x2da   : > { %1136 = vst [vmem:[#allocation2 + $0x68] sm:$0xff] %v1120_v27 }
 0x2db   : > { %v1071_v31 = vmul.f32 0.25, %v997_v29  ;;  %v1000_v32 = vadd.f32 %v1467_v30, %v2072_v58  ;;  %vm1039_vm12 = vcmp.gt.f32.partialorder %v997_v29, 0.0 }
 0x2dd   : > { %vm1040_vm13 = vcmp.gt.f32.partialorder %v1000_v32, 0.0  ;;  %v1072_v34 = vmul.f32 0.25, %v1000_v32  ;;  %v1468_v37 = vpop.f32.mrb[44].mxu1  ;;  %v1103_v39 = vsel %vm1039_vm12, %v997_v29, %v1071_v31 }
 0x2de   : > { %v1469_v38 = vpop.f32.mrb[45].mxu1  ;;  %1171 = vst [vmem:[#allocation9 + $0xe0] sm:$0xff] (!%p1332_p11), %v1103_v39 }
 0x2df   : > { %v1104_v40 = vsel %vm1040_vm13, %v1000_v32, %v1072_v34  ;;  %v1470_v47 = vadd.f32 %v1469_v38, %v1468_v37  ;;  %v1471_v48 = vpop.f32.mrb[46].mxu1 }
 0x2e0   : > { %v1121_v49 = vpack.c.bf16 %v1104_v40, %v1103_v39  ;;  %v1472_v50 = vpop.f32.mrb[47].mxu1  ;;  %1172 = vst [vmem:[#allocation9 + $0xe8] sm:$0xff] (!%p1332_p11), %v1104_v40 }
 0x2e1   : > { %v1005_v51 = vadd.f32 %v1470_v47, %v2072_v58  ;;  %v1473_v53 = vadd.f32 %v1472_v50, %v1471_v48 }
 0x2e2   : > { %1137 = vst [vmem:[#allocation2 + $0x70] sm:$0xff] %v1121_v49 }
 0x2e3   : > { %v1073_v56 = vmul.f32 0.25, %v1005_v51  ;;  %v1008_v57 = vadd.f32 %v1473_v53, %v2072_v58  ;;  %vm1041_vm14 = vcmp.gt.f32.partialorder %v1005_v51, 0.0 }
 0x2e4   : > { %1142 = sbr.rel (%p1332_p11) target bundleno = 747 (0x2eb), region = 56 }
 0x2e5   : > { %vm1042_vm15 = vcmp.gt.f32.partialorder %v1008_v57, 0.0  ;;  %v1074_v59 = vmul.f32 0.25, %v1008_v57  ;;  %v1105_v60 = vsel %vm1041_vm14, %v1005_v51, %v1073_v56 }
 0x2e6   : > { %1173 = vst [vmem:[#allocation9 + $0xf0] sm:$0xff] (!%p1332_p11), %v1105_v60 }
 0x2e7   : > { %v1106_v61 = vsel %vm1042_vm15, %v1008_v57, %v1074_v59 }
 0x2e8   : > { %v1122_v0 = vpack.c.bf16 %v1106_v61, %v1105_v60  ;;  %1174 = vst [vmem:[#allocation9 + $0xf8] sm:$0xff] (!%p1332_p11), %v1106_v61 }
 0x2ea   : > { %1138 = vst [vmem:[#allocation2 + $0x78] sm:$0xff] %v1122_v0 }
 0x2eb PF: > { %p1568_p13 = scmp.eq.s32.totalorder %s1897_s19, 2  ;;  %s1850_s24 = smov [#allocation9]  }
 0x2ec   : > { %s1181_s18 = sshll.u32 %s1850_s24, 4  ;;  %s1182_s18 = int_to_ptr.vmem [resolvable:$true] %s1181_s18 }
 0x2ed   : > { %s1769_s11 = scalar_lea.vmem %s1182_s18, 4096  ;;  %p1776_p0 = scmp.lt.s32.totalorder %s1182_s18, %s1182_s18 }
 0x2ee   : > { %p1770_p12 = scmp.ne.s32.totalorder %s1182_s18, %s1769_s11  ;;  %p1777_p5 = scmp.lt.s32.totalorder %s1769_s11, %s1769_s11 }
 0x2f0   : > { %p1771_p8 = pnand %p1770_p12, %p1568_p13  ;;  %p1778_p9 = por %p1777_p5, %p1776_p0 }
 0x2f2   : > { %p1772_p10 = pneg %p1771_p8 }
 0x2f4   : > { %p1779_p1 = pnand %p1778_p9, %p1772_p10 }
 0x2f6   : > { %1782 = shalt.err (!%p1779_p1)
}
 0x2f7   : > { %s1783_s21 = scalar_lea.hbm %s2251_s4, 4096 }
 0x2f8   : > { %p1784_p3 = scmp.ne.s32.totalorder %s2251_s4, %s1783_s21  ;;  %p1789_p4 = scmp.lt.u32.totalorder %s1783_s21, %s2251_s4 }
 0x2fa   : > { %p1785_p6 = pnand %p1784_p3, %p1568_p13 }
 0x2fc   : > { %p1786_p2 = pneg %p1785_p6 }
 0x2fe   : > { %p1791_p7 = pnand %p1789_p4, %p1786_p2 }
 0x300   : > { %1794 = shalt.err (!%p1791_p7)
}
 0x301   : > { %s1851_s30 = smov 128   ;;  %s1852_s13 = smov 8  }
 0x302   : > { %1549 = dma.vmem_to_hbm [thread:$0]  (%p1568_p13), %s1182_s18, 4096, %s2251_s4, [#allocation5], %s1851_s30, %s1851_s30, %s1852_s13  }
 0x303   : > { %1824 = dma.done.wait (%p1568_p13), [#allocation5], 4096  }
 0x304   : > { %1826 = vsyncadd (%p1568_p13), [#allocation5], 4294963200 }
 0x305 PF: > { %p14_p11 = scmp.ge.s32.totalorder %s1900_s20, 5   ;;  %s2269_s15 = smov %s1833_s16 }
 0x306   : > { %s2270_s16 = smov %s1837_s17  ;;  %s2271_s17 = smov %s1910_s23 }
 0x307   : > { %s2272_s18 = smov %s1900_s20  ;;  %16 = sbr.rel (!%p14_p11) target bundleno = 4 (0x4), region = 91 }
 0x30e   :  { %1197 = vsyncpa [#allocation4], 1 }
 0x30f   :  { %1199 = vsyncpa [#allocation4 + $0x1], 1 }
 0x310   :  { %1200 = vsyncpa [#allocation7], 1 }
 0x311   :  { %1201 = vsyncpa [#allocation5], 1 }
 0x312   :  { %1203 = vsyncpa [#allocation5 + $0x1], 1 }

</bundles_post_ra>
